<compile_context>
chip_gen: v7x
topology: tpu7x:2x2x1
jax: 0.10.0
libtpu: 0.0.40
codegen_flags: <defaults>
</compile_context>

<pallas_src>
import functools

import jax
import jax.numpy as jnp
from jax.experimental import pallas as pl
from jax.experimental.pallas import tpu as pltpu


def _bilinear_matrix(in_size: int, out_size: int) -> jnp.ndarray:
    """Interpolation matrix M (out_size, in_size): y = M @ x is bilinear resize
    along one axis with align_corners=False, antialias=False."""
    scale = in_size / out_size
    i = jnp.arange(out_size, dtype=jnp.float32)
    src = jnp.maximum((i + 0.5) * scale - 0.5, 0.0)
    i0 = jnp.clip(jnp.floor(src).astype(jnp.int32), 0, in_size - 1)
    i1 = jnp.clip(i0 + 1, 0, in_size - 1)
    w1 = src - i0.astype(jnp.float32)
    w0 = 1.0 - w1
    rows = jnp.arange(out_size)
    m = jnp.zeros((out_size, in_size), jnp.float32)
    m = m.at[rows, i0].add(w0)
    m = m.at[rows, i1].add(w1)
    return m


def _resize_normalize_kernel(x_ref, k_ref, scale_ref, bias_ref, o_ref):
    """One grid step = a tile of rows (images) of the flattened batch.

    x_ref     : (rt, H*W)           VMEM   flattened images (lane-dense)
    k_ref     : (H*W, H_out*W_out)  VMEM   combined bilinear-resize matrix
    scale_ref : (rt, 1)             VMEM   1/std  per (n, c) row
    bias_ref  : (rt, 1)             VMEM   -mean/std per (n, c) row
    o_ref     : (rt, H_out*W_out)   VMEM   lane-dense output (256 lanes)
    """
    out = jnp.dot(x_ref[...], k_ref[...], preferred_element_type=jnp.float32)
    o_ref[...] = out * scale_ref[...] + bias_ref[...]


@functools.partial(jax.jit, static_argnames=("image_size",))
def transform_forward(x, image_size, norm_mean, norm_std):
    """Equivalent of Transform(image_size, 'gpu,resize,normalize').forward(x).

    x: (N, C, H, W) float32, NCHW.  Returns (N, C, image_size, image_size) f32.
    """
    N, C, H, W = x.shape
    NC = N * C
    H_out = W_out = image_size
    HWi = H * W
    HWo = H_out * W_out

    # Combined separable resize matrix:
    #   K[h*W + w, ho*W_out + wo] = rh[ho, h] * rw[wo, w]
    rh = _bilinear_matrix(H, H_out)          # (H_out, H)
    rw = _bilinear_matrix(W, W_out)          # (W_out, W)
    kmat = jnp.kron(rh, rw).T                # (H*W, H_out*W_out)

    # Normalize folded into per-row affine (input is floating point -> no /255).
    mean = jnp.asarray(norm_mean, jnp.float32)
    inv_std = 1.0 / jnp.asarray(norm_std, jnp.float32)
    scale = jnp.tile(inv_std, N).reshape(NC, 1)          # (NC, 1)
    bias = jnp.tile(-mean * inv_std, N).reshape(NC, 1)   # (NC, 1)

    x_flat = x.astype(jnp.float32).reshape(NC, HWi)

    # Row tiling: one step for small batches; multiple-of-8 row tiles (parallel
    # grid axis -> megacore on v7x) when the batch is large.
    row_tile = NC
    for cand in (512, 256, 128, 64, 32, 16, 8):
        if NC >= cand and NC % cand == 0:
            row_tile = cand
            break
    grid = (NC // row_tile,)

    cost = pl.CostEstimate(
        flops=2 * NC * HWi * HWo + 2 * NC * HWo,
        transcendentals=0,
        bytes_accessed=4 * (NC * HWi + HWi * HWo + NC * HWo + 2 * NC),
    )

    out_flat = pl.pallas_call(
        _resize_normalize_kernel,
        out_shape=jax.ShapeDtypeStruct((NC, HWo), jnp.float32),
        grid=grid,
        in_specs=[
            pl.BlockSpec((row_tile, HWi), lambda i: (i, 0)),
            pl.BlockSpec((HWi, HWo), lambda i: (0, 0)),
            pl.BlockSpec((row_tile, 1), lambda i: (i, 0)),
            pl.BlockSpec((row_tile, 1), lambda i: (i, 0)),
        ],
        out_specs=pl.BlockSpec((row_tile, HWo), lambda i: (i, 0)),
        compiler_params=pltpu.CompilerParams(
            dimension_semantics=("parallel",),
        ),
        cost_estimate=cost,
    )(x_flat, kmat, scale, bias)

    return out_flat.reshape(N, C, H_out, W_out)


def _reference(x, image_size, norm_mean, norm_std):
    """Pure-JAX reference for correctness check."""
    rh = _bilinear_matrix(x.shape[2], image_size)
    rw = _bilinear_matrix(x.shape[3], image_size)
    resized = jnp.einsum("oh,nchw,pw->ncop", rh, x.astype(jnp.float32), rw)
    mean = jnp.asarray(norm_mean, jnp.float32)[None, :, None, None]
    std = jnp.asarray(norm_std, jnp.float32)[None, :, None, None]
    return (resized - mean) / std


if __name__ == "__main__":
    key = jax.random.PRNGKey(0)
    N, C, H, W = 2, 3, 32, 32
    image_size = 16
    norm_mean = (0.5, 0.5, 0.5)
    norm_std = (0.5, 0.5, 0.5)

    # Float image in [0, 1], NCHW (PyTorch convention).
    x = jax.random.uniform(key, (N, C, H, W), dtype=jnp.float32)

    out = transform_forward(x, image_size, norm_mean, norm_std)
    out = jax.block_until_ready(out)

    ref = _reference(x, image_size, norm_mean, norm_std)
    assert out.shape == (N, C, image_size, image_size)
    assert jnp.allclose(out, ref, atol=1e-4, rtol=1e-4)

    print("KERNEL_OK")
</pallas_src>

<mosaic_0001>
module attributes {stable_mosaic.version = 11 : i64} {
  func.func private @main(%arg0: i32) attributes {dimension_semantics = [#tpu.dimension_semantics<core_parallel>], iteration_bounds = array<i64: 2>, tpu.core_type = #tpu.core_type<sc_scalar_subcore>, window_params = []} {
    return
  }
}

module attributes {stable_mosaic.version = 11 : i64} {
  func.func private @main(%arg0: i32) attributes {dimension_semantics = [#tpu.dimension_semantics<core_parallel>], iteration_bounds = array<i64: 2>, tpu.core_type = #tpu.core_type<sc_scalar_subcore>, window_params = []} {
    return
  }
}

module attributes {stable_mosaic.version = 11 : i64} {
  func.func @_resize_normalize_kernel(%arg0: i32, %arg1: memref<6x1024xf32, #tpu.memory_space<vmem>>, %arg2: memref<1024x256xf32, #tpu.memory_space<vmem>>, %arg3: memref<6x1xf32, #tpu.memory_space<vmem>>, %arg4: memref<6x1xf32, #tpu.memory_space<vmem>>, %arg5: memref<6x256xf32, #tpu.memory_space<vmem>>) attributes {dimension_semantics = [#tpu.dimension_semantics<parallel>], iteration_bounds = array<i64: 1>, scalar_prefetch = 0 : i64, scratch_operands = 0 : i64, tpu.core_type = #tpu.core_type<tc>, window_params = [{transform_indices = @transform_0, window_bounds = array<i64: 6, 1024>}, {pipeline_mode = #tpu.pipeline_mode<synchronous>, transform_indices = @transform_1, window_bounds = array<i64: 1024, 256>}, {transform_indices = @transform_2, window_bounds = array<i64: 6, 1>}, {transform_indices = @transform_3, window_bounds = array<i64: 6, 1>}, {transform_indices = @transform_4, window_bounds = array<i64: 6, 256>}]} {
    %c0 = arith.constant 0 : index
    %c0_0 = arith.constant 0 : index
    %0 = vector.load %arg1[%c0, %c0_0] : memref<6x1024xf32, #tpu.memory_space<vmem>>, vector<6x1024xf32>
    %c0_1 = arith.constant 0 : index
    %c0_2 = arith.constant 0 : index
    %1 = vector.load %arg2[%c0_1, %c0_2] : memref<1024x256xf32, #tpu.memory_space<vmem>>, vector<1024x256xf32>
    %cst = arith.constant dense<0.000000e+00> : vector<6x256xf32>
    %2 = tpu.matmul %0, %1, %cst {dimension_numbers = #tpu.dot_dimension_numbers<[1], [0], [0], [1], [0, 0, 1, 1], [], []>} : vector<6x1024xf32>, vector<1024x256xf32>, vector<6x256xf32> -> vector<6x256xf32>
    %c0_3 = arith.constant 0 : index
    %c0_4 = arith.constant 0 : index
    %3 = vector.load %arg3[%c0_3, %c0_4] : memref<6x1xf32, #tpu.memory_space<vmem>>, vector<6x1xf32>
    %4 = vector.broadcast %3 : vector<6x1xf32> to vector<6x256xf32>
    %5 = arith.mulf %2, %4 : vector<6x256xf32>
    %c0_5 = arith.constant 0 : index
    %c0_6 = arith.constant 0 : index
    %6 = vector.load %arg4[%c0_5, %c0_6] : memref<6x1xf32, #tpu.memory_space<vmem>>, vector<6x1xf32>
    %7 = vector.broadcast %6 : vector<6x1xf32> to vector<6x256xf32>
    %8 = arith.addf %5, %7 : vector<6x256xf32>
    %c0_7 = arith.constant 0 : index
    %c0_8 = arith.constant 0 : index
    %9 = vector.load %arg5[%c0_7, %c0_8] : memref<6x256xf32, #tpu.memory_space<vmem>>, vector<6x256xf32>
    tpu.vector_store %arg5[%c0_7, %c0_8], %8 {strides = array<i32>} : memref<6x256xf32, #tpu.memory_space<vmem>>, vector<6x256xf32>,
    return
  }
  func.func @transform_0(%arg0: i32) -> (i32, i32) {
    %c0_i32 = arith.constant 0 : i32
    %c0_i32_0 = arith.constant 0 : i32
    return %arg0, %c0_i32 : i32, i32
  }
  func.func @transform_1(%arg0: i32) -> (i32, i32) {
    %c0_i32 = arith.constant 0 : i32
    %c0_i32_0 = arith.constant 0 : i32
    %c0_i32_1 = arith.constant 0 : i32
    return %c0_i32, %c0_i32_0 : i32, i32
  }
  func.func @transform_2(%arg0: i32) -> (i32, i32) {
    %c0_i32 = arith.constant 0 : i32
    %c0_i32_0 = arith.constant 0 : i32
    return %arg0, %c0_i32 : i32, i32
  }
  func.func @transform_3(%arg0: i32) -> (i32, i32) {
    %c0_i32 = arith.constant 0 : i32
    %c0_i32_0 = arith.constant 0 : i32
    return %arg0, %c0_i32 : i32, i32
  }
  func.func @transform_4(%arg0: i32) -> (i32, i32) {
    %c0_i32 = arith.constant 0 : i32
    %c0_i32_0 = arith.constant 0 : i32
    return %arg0, %c0_i32 : i32, i32
  }
}

</mosaic_0001>

<bundles_post_ra>
// kernel: tile.0
= control target key start
LH: loop header
LB: loop body
LE: loop exit
PB: predicated region body
PF: predicated region fallthrough
CT: control target
= control target key end

     0   :  { %vm7_vm0 = vcmask 7168   ;;  %s26_s10 = smov 126   ;;  %s49_s0 = inlined_call_operand.vmem [shape: f32[2,3], index: 0, kind: input, shape index: {}]   ;;  %s50_s1 = inlined_call_operand.vmem [shape: f32[6,1], index: 1, kind: output, shape index: {}]  }
   0x1   :  { %v4_v0 = vld [vmem:[%s49_s0] sm:$0x3]  ;;  %s25_s0 = smov 127  }
   0x2   :  { %5 = vst [vmem:[#allocation0] sm:$0x3] %v4_v0 }
   0x9   :  { %v9_v1 = vld [vmem:[#allocation0] sm:$0x3]  }
   0xa   :  { %v6_v2 = vld [vmem:[#allocation0] sm:$0x3]   ;;  %10 = vrot.lane.b32.xlu0 %v9_v1, %s25_s0 }
   0xb   :  { %8 = vst.msk [vmem:[%s50_s1] ss:$3 sm:$0x3] %vm7_vm0, %v6_v2   ;;  %v15_v3 = vld [vmem:[#allocation0] sm:$0x3]  }
   0xe   :  { %16 = vrot.lane.b32.xlu0 %v15_v3, %s26_s10 }
  0x7c   :  { %v11_v4 = vpop.permute.xlu0 %10  }
  0x7d   :  { %21 = vst.msk [vmem:[%s50_s1 + $0x1] ss:$3 sm:$0x3] %vm7_vm0, %v11_v4  }
  0x80   :  { %v17_v5 = vpop.permute.xlu0 %16  }
  0x81   :  { %22 = vst.msk [vmem:[%s50_s1 + $0x2] ss:$3 sm:$0x3] %vm7_vm0, %v17_v5  }

// kernel: tile.13
= control target key start
LH: loop header
LB: loop body
LE: loop exit
PB: predicated region body
PF: predicated region fallthrough
CT: control target
= control target key end

     0   :  { %s22_s0 = inlined_call_operand.vmem [shape: f32[3], index: 0, kind: input, shape index: {}]   ;;  %s23_s1 = inlined_call_operand.vmem [shape: f32[2,3], index: 1, kind: output, shape index: {}]  }
   0x1   :  { %v4_v0 = vld [vmem:[%s22_s0] ss:$0 sm:$0xff] }
   0x2   :  { %5 = vst [vmem:[%s23_s1] sm:$0x3] %v4_v0 }

// kernel: transform_forward.1
= control target key start
LH: loop header
LB: loop body
LE: loop exit
PB: predicated region body
PF: predicated region fallthrough
CT: control target
= control target key end

     0   :  { %v851_v25 = vmov 0   ;;  %s1681_s1 = inlined_call_operand.vmem [shape: f32[1024,256], index: 1, kind: input, shape index: {}]   ;;  %s1682_s0 = inlined_call_operand.vmem [shape: f32[6,1024], index: 0, kind: input, shape index: {}]   ;;  %s1683_s2 = inlined_call_operand.vmem [shape: f32[6,1], index: 2, kind: input, shape index: {}]   ;;  %s1684_s3 = inlined_call_operand.vmem [shape: f32[6,1], index: 3, kind: input, shape index: {}]   ;;  %s1685_s4 = inlined_call_operand.vmem [shape: f32[6,256], index: 4, kind: output, shape index: {}]  }
   0x1   :  { %v26_v0 = vld [vmem:[%s1681_s1 + $0x8] sm:$0xff]  ;;  %v28_v1 = vld [vmem:[%s1681_s1 + $0x18] sm:$0xff]  ;;  %v25_v5 = vld [vmem:[%s1681_s1] sm:$0xff]  ;;  %850 = vset.pattern.permute.xlu0 %v851_v25 }
   0x2   :  { %v154_v2 = vld [vmem:[%s1681_s1 + $0x408] sm:$0xff]  ;;  %v587_v3 = vpack.c.bf16 %v28_v1, %v26_v0  ;;  %v156_v4 = vld [vmem:[%s1681_s1 + $0x418] sm:$0xff]  ;;  %v27_v6 = vld [vmem:[%s1681_s1 + $0x10] sm:$0xff] }
   0x3   :  { %v715_v7 = vpack.c.bf16 %v156_v4, %v154_v2  ;;  %v589_v8 = vpack.c.bf16 %v27_v6, %v25_v5  ;;  %v153_v9 = vld [vmem:[%s1681_s1 + $0x400] sm:$0xff]  ;;  %v155_v10 = vld [vmem:[%s1681_s1 + $0x410] sm:$0xff]  ;;  %v30_v11 = vld [vmem:[%s1681_s1 + $0x28] sm:$0xff] }
   0x4   :  { %588 = vmatprep.subr.bf16.mxu1 %v587_v3  ;;  %v717_v12 = vpack.c.bf16 %v155_v10, %v153_v9  ;;  %v32_v13 = vld [vmem:[%s1681_s1 + $0x38] sm:$0xff]  ;;  %v158_v14 = vld [vmem:[%s1681_s1 + $0x428] sm:$0xff]  ;;  %v29_v18 = vld [vmem:[%s1681_s1 + $0x20] sm:$0xff] }
   0x5   :  { %v160_v15 = vld [vmem:[%s1681_s1 + $0x438] sm:$0xff]  ;;  %716 = vmatprep.subr.bf16.mxu0 %v715_v7  ;;  %590 = vmatpush1.bf16.msra.mxu1 %v589_v8  ;;  %v591_v16 = vpack.c.bf16 %v32_v13, %v30_v11  ;;  %v31_v19 = vld [vmem:[%s1681_s1 + $0x30] sm:$0xff]  ;;  %v157_v20 = vld [vmem:[%s1681_s1 + $0x420] sm:$0xff] }
   0x6   :  { %v719_v17 = vpack.c.bf16 %v160_v15, %v158_v14  ;;  %718 = vmatpush1.bf16.msra.mxu0 %v717_v12  ;;  %v593_v21 = vpack.c.bf16 %v31_v19, %v29_v18  ;;  %v159_v22 = vld [vmem:[%s1681_s1 + $0x430] sm:$0xff]  ;;  %v34_v23 = vld [vmem:[%s1681_s1 + $0x48] sm:$0xff]  ;;  %v36_v24 = vld [vmem:[%s1681_s1 + $0x58] sm:$0xff] }
   0x7   :  { %592 = vmatprep.subr.bf16.mxu1 %v591_v16  ;;  %v721_v26 = vpack.c.bf16 %v159_v22, %v157_v20  ;;  %v595_v27 = vpack.c.bf16 %v36_v24, %v34_v23  ;;  %v162_v28 = vld [vmem:[%s1681_s1 + $0x448] sm:$0xff]  ;;  %v164_v29 = vld [vmem:[%s1681_s1 + $0x458] sm:$0xff]  ;;  %v33_v30 = vld [vmem:[%s1681_s1 + $0x40] sm:$0xff] }
   0x8   :  { %720 = vmatprep.subr.bf16.mxu0 %v719_v17  ;;  %v723_v31 = vpack.c.bf16 %v164_v29, %v162_v28  ;;  %v35_v32 = vld [vmem:[%s1681_s1 + $0x50] sm:$0xff]  ;;  %v161_v33 = vld [vmem:[%s1681_s1 + $0x440] sm:$0xff]  ;;  %v38_v36 = vld [vmem:[%s1681_s1 + $0x68] sm:$0xff] }
   0x9   :  { %v163_v34 = vld [vmem:[%s1681_s1 + $0x450] sm:$0xff]  ;;  %594 = vmatpush1.bf16.msra.mxu1 %v593_v21  ;;  %v597_v35 = vpack.c.bf16 %v35_v32, %v33_v30  ;;  %v40_v37 = vld [vmem:[%s1681_s1 + $0x78] sm:$0xff]  ;;  %v166_v38 = vld [vmem:[%s1681_s1 + $0x468] sm:$0xff] }
   0xa   :  { %722 = vmatpush1.bf16.msra.mxu0 %v721_v26  ;;  %596 = vmatprep.subr.bf16.mxu1 %v595_v27  ;;  %v725_v39 = vpack.c.bf16 %v163_v34, %v161_v33  ;;  %v599_v40 = vpack.c.bf16 %v40_v37, %v38_v36  ;;  %v168_v41 = vld [vmem:[%s1681_s1 + $0x478] sm:$0xff]  ;;  %v37_v42 = vld [vmem:[%s1681_s1 + $0x60] sm:$0xff]  ;;  %v39_v43 = vld [vmem:[%s1681_s1 + $0x70] sm:$0xff] }
   0xb   :  { %724 = vmatprep.subr.bf16.mxu0 %v723_v31  ;;  %v727_v44 = vpack.c.bf16 %v168_v41, %v166_v38  ;;  %v165_v45 = vld [vmem:[%s1681_s1 + $0x460] sm:$0xff]  ;;  %v167_v46 = vld [vmem:[%s1681_s1 + $0x470] sm:$0xff]  ;;  %v42_v47 = vld [vmem:[%s1681_s1 + $0x88] sm:$0xff]  ;;  %v601_v51 = vpack.c.bf16 %v39_v43, %v37_v42 }
   0xc   :  { %v44_v48 = vld [vmem:[%s1681_s1 + $0x98] sm:$0xff]  ;;  %v170_v49 = vld [vmem:[%s1681_s1 + $0x488] sm:$0xff]  ;;  %v729_v52 = vpack.c.bf16 %v167_v46, %v165_v45  ;;  %v41_v54 = vld [vmem:[%s1681_s1 + $0x80] sm:$0xff] }
   0xd   :  { %v172_v50 = vld [vmem:[%s1681_s1 + $0x498] sm:$0xff]  ;;  %598 = vmatpush1.bf16.msra.mxu1 %v597_v35  ;;  %v603_v53 = vpack.c.bf16 %v44_v48, %v42_v47  ;;  %v43_v55 = vld [vmem:[%s1681_s1 + $0x90] sm:$0xff]  ;;  %v169_v56 = vld [vmem:[%s1681_s1 + $0x480] sm:$0xff] }
   0xe   :  { %726 = vmatpush1.bf16.msra.mxu0 %v725_v39  ;;  %600 = vmatprep.subr.bf16.mxu1 %v599_v40  ;;  %v731_v57 = vpack.c.bf16 %v172_v50, %v170_v49  ;;  %v171_v58 = vld [vmem:[%s1681_s1 + $0x490] sm:$0xff]  ;;  %v46_v59 = vld [vmem:[%s1681_s1 + $0xa8] sm:$0xff]  ;;  %v48_v60 = vld [vmem:[%s1681_s1 + $0xb8] sm:$0xff]  ;;  %v605_v63 = vpack.c.bf16 %v43_v55, %v41_v54 }
   0xf   :  { %728 = vmatprep.subr.bf16.mxu0 %v727_v44  ;;  %v174_v61 = vld [vmem:[%s1681_s1 + $0x4a8] sm:$0xff]  ;;  %v176_v62 = vld [vmem:[%s1681_s1 + $0x4b8] sm:$0xff]  ;;  %v733_v0 = vpack.c.bf16 %v171_v58, %v169_v56  ;;  %v607_v1 = vpack.c.bf16 %v48_v60, %v46_v59  ;;  %v45_v2 = vld [vmem:[%s1681_s1 + $0xa0] sm:$0xff] }
  0x10   :  { %v47_v3 = vld [vmem:[%s1681_s1 + $0xb0] sm:$0xff]  ;;  %v173_v4 = vld [vmem:[%s1681_s1 + $0x4a0] sm:$0xff]  ;;  %v735_v5 = vpack.c.bf16 %v176_v62, %v174_v61  ;;  %v50_v7 = vld [vmem:[%s1681_s1 + $0xc8] sm:$0xff] }
  0x11   :  { %602 = vmatpush1.bf16.msra.mxu1 %v601_v51  ;;  %v175_v6 = vld [vmem:[%s1681_s1 + $0x4b0] sm:$0xff]  ;;  %v52_v8 = vld [vmem:[%s1681_s1 + $0xd8] sm:$0xff]  ;;  %v178_v9 = vld [vmem:[%s1681_s1 + $0x4c8] sm:$0xff]  ;;  %v609_v11 = vpack.c.bf16 %v47_v3, %v45_v2 }
  0x12   :  { %730 = vmatpush1.bf16.msra.mxu0 %v729_v52  ;;  %604 = vmatprep.subr.bf16.mxu1 %v603_v53  ;;  %v180_v10 = vld [vmem:[%s1681_s1 + $0x4d8] sm:$0xff]  ;;  %v737_v12 = vpack.c.bf16 %v175_v6, %v173_v4  ;;  %v611_v13 = vpack.c.bf16 %v52_v8, %v50_v7  ;;  %v49_v14 = vld [vmem:[%s1681_s1 + $0xc0] sm:$0xff]  ;;  %v51_v15 = vld [vmem:[%s1681_s1 + $0xd0] sm:$0xff] }
  0x13   :  { %732 = vmatprep.subr.bf16.mxu0 %v731_v57  ;;  %v177_v16 = vld [vmem:[%s1681_s1 + $0x4c0] sm:$0xff]  ;;  %v739_v17 = vpack.c.bf16 %v180_v10, %v178_v9  ;;  %v179_v18 = vld [vmem:[%s1681_s1 + $0x4d0] sm:$0xff]  ;;  %v54_v19 = vld [vmem:[%s1681_s1 + $0xe8] sm:$0xff]  ;;  %v613_v23 = vpack.c.bf16 %v51_v15, %v49_v14 }
  0x14   :  { %v56_v20 = vld [vmem:[%s1681_s1 + $0xf8] sm:$0xff]  ;;  %v182_v21 = vld [vmem:[%s1681_s1 + $0x4e8] sm:$0xff]  ;;  %v741_v24 = vpack.c.bf16 %v179_v18, %v177_v16  ;;  %v53_v26 = vld [vmem:[%s1681_s1 + $0xe0] sm:$0xff] }
  0x15   :  { %606 = vmatpush1.bf16.msra.mxu1 %v605_v63  ;;  %v184_v22 = vld [vmem:[%s1681_s1 + $0x4f8] sm:$0xff]  ;;  %v615_v25 = vpack.c.bf16 %v56_v20, %v54_v19  ;;  %v55_v27 = vld [vmem:[%s1681_s1 + $0xf0] sm:$0xff]  ;;  %v181_v28 = vld [vmem:[%s1681_s1 + $0x4e0] sm:$0xff] }
  0x16   :  { %734 = vmatpush1.bf16.msra.mxu0 %v733_v0  ;;  %608 = vmatprep.subr.bf16.mxu1 %v607_v1  ;;  %v743_v29 = vpack.c.bf16 %v184_v22, %v182_v21  ;;  %v183_v30 = vld [vmem:[%s1681_s1 + $0x4f0] sm:$0xff]  ;;  %v58_v31 = vld [vmem:[%s1681_s1 + $0x108] sm:$0xff]  ;;  %v60_v32 = vld [vmem:[%s1681_s1 + $0x118] sm:$0xff]  ;;  %v617_v35 = vpack.c.bf16 %v55_v27, %v53_v26 }
  0x17   :  { %736 = vmatprep.subr.bf16.mxu0 %v735_v5  ;;  %v186_v33 = vld [vmem:[%s1681_s1 + $0x508] sm:$0xff]  ;;  %v188_v34 = vld [vmem:[%s1681_s1 + $0x518] sm:$0xff]  ;;  %v745_v36 = vpack.c.bf16 %v183_v30, %v181_v28  ;;  %v619_v37 = vpack.c.bf16 %v60_v32, %v58_v31  ;;  %v57_v38 = vld [vmem:[%s1681_s1 + $0x100] sm:$0xff] }
  0x18   :  { %v59_v39 = vld [vmem:[%s1681_s1 + $0x110] sm:$0xff]  ;;  %v185_v40 = vld [vmem:[%s1681_s1 + $0x500] sm:$0xff]  ;;  %v747_v41 = vpack.c.bf16 %v188_v34, %v186_v33  ;;  %v62_v43 = vld [vmem:[%s1681_s1 + $0x128] sm:$0xff] }
  0x19   :  { %610 = vmatpush1.bf16.msra.mxu1 %v609_v11  ;;  %v187_v42 = vld [vmem:[%s1681_s1 + $0x510] sm:$0xff]  ;;  %v64_v44 = vld [vmem:[%s1681_s1 + $0x138] sm:$0xff]  ;;  %v190_v45 = vld [vmem:[%s1681_s1 + $0x528] sm:$0xff]  ;;  %v621_v47 = vpack.c.bf16 %v59_v39, %v57_v38 }
  0x1a   :  { %738 = vmatpush1.bf16.msra.mxu0 %v737_v12  ;;  %612 = vmatprep.subr.bf16.mxu1 %v611_v13  ;;  %v192_v46 = vld [vmem:[%s1681_s1 + $0x538] sm:$0xff]  ;;  %v749_v48 = vpack.c.bf16 %v187_v42, %v185_v40  ;;  %v623_v49 = vpack.c.bf16 %v64_v44, %v62_v43  ;;  %v61_v50 = vld [vmem:[%s1681_s1 + $0x120] sm:$0xff]  ;;  %v63_v51 = vld [vmem:[%s1681_s1 + $0x130] sm:$0xff] }
  0x1b   :  { %740 = vmatprep.subr.bf16.mxu0 %v739_v17  ;;  %v189_v52 = vld [vmem:[%s1681_s1 + $0x520] sm:$0xff]  ;;  %v751_v53 = vpack.c.bf16 %v192_v46, %v190_v45  ;;  %v191_v54 = vld [vmem:[%s1681_s1 + $0x530] sm:$0xff]  ;;  %v66_v55 = vld [vmem:[%s1681_s1 + $0x148] sm:$0xff]  ;;  %v625_v59 = vpack.c.bf16 %v63_v51, %v61_v50 }
  0x1c   :  { %v68_v56 = vld [vmem:[%s1681_s1 + $0x158] sm:$0xff]  ;;  %v194_v57 = vld [vmem:[%s1681_s1 + $0x548] sm:$0xff]  ;;  %v753_v60 = vpack.c.bf16 %v191_v54, %v189_v52  ;;  %v65_v62 = vld [vmem:[%s1681_s1 + $0x140] sm:$0xff] }
  0x1d   :  { %614 = vmatpush1.bf16.msra.mxu1 %v613_v23  ;;  %v196_v58 = vld [vmem:[%s1681_s1 + $0x558] sm:$0xff]  ;;  %v627_v61 = vpack.c.bf16 %v68_v56, %v66_v55  ;;  %v67_v63 = vld [vmem:[%s1681_s1 + $0x150] sm:$0xff]  ;;  %v193_v0 = vld [vmem:[%s1681_s1 + $0x540] sm:$0xff] }
  0x1e   :  { %742 = vmatpush1.bf16.msra.mxu0 %v741_v24  ;;  %616 = vmatprep.subr.bf16.mxu1 %v615_v25  ;;  %v755_v1 = vpack.c.bf16 %v196_v58, %v194_v57  ;;  %v195_v2 = vld [vmem:[%s1681_s1 + $0x550] sm:$0xff]  ;;  %v70_v3 = vld [vmem:[%s1681_s1 + $0x168] sm:$0xff]  ;;  %v72_v4 = vld [vmem:[%s1681_s1 + $0x178] sm:$0xff]  ;;  %v629_v7 = vpack.c.bf16 %v67_v63, %v65_v62 }
  0x1f   :  { %744 = vmatprep.subr.bf16.mxu0 %v743_v29  ;;  %v198_v5 = vld [vmem:[%s1681_s1 + $0x568] sm:$0xff]  ;;  %v200_v6 = vld [vmem:[%s1681_s1 + $0x578] sm:$0xff]  ;;  %v69_v8 = vld [vmem:[%s1681_s1 + $0x160] sm:$0xff]  ;;  %v757_v9 = vpack.c.bf16 %v195_v2, %v193_v0  ;;  %v631_v10 = vpack.c.bf16 %v72_v4, %v70_v3 }
  0x20   :  { %v71_v11 = vld [vmem:[%s1681_s1 + $0x170] sm:$0xff]  ;;  %v197_v12 = vld [vmem:[%s1681_s1 + $0x560] sm:$0xff]  ;;  %v759_v14 = vpack.c.bf16 %v200_v6, %v198_v5  ;;  %v74_v15 = vld [vmem:[%s1681_s1 + $0x188] sm:$0xff] }
  0x21   :  { %618 = vmatpush1.bf16.msra.mxu1 %v617_v35  ;;  %v199_v13 = vld [vmem:[%s1681_s1 + $0x570] sm:$0xff]  ;;  %v76_v16 = vld [vmem:[%s1681_s1 + $0x198] sm:$0xff]  ;;  %v18_v17 = vld [vmem:[%s1682_s0 + $0x8] sm:$0x3f]  ;;  %v633_v21 = vpack.c.bf16 %v71_v11, %v69_v8 }
  0x22   :  { %746 = vmatpush1.bf16.msra.mxu0 %v745_v36  ;;  %620 = vmatprep.subr.bf16.mxu1 %v619_v37  ;;  %v202_v18 = vld [vmem:[%s1681_s1 + $0x588] sm:$0xff]  ;;  %v204_v19 = vld [vmem:[%s1681_s1 + $0x598] sm:$0xff]  ;;  %v761_v22 = vpack.c.bf16 %v199_v13, %v197_v12  ;;  %v635_v23 = vpack.c.bf16 %v76_v16, %v74_v15  ;;  %v73_v24 = vld [vmem:[%s1681_s1 + $0x180] sm:$0xff] }
  0x23   :  { %748 = vmatprep.subr.bf16.mxu0 %v747_v41  ;;  %345 = vmatprep.mubr.f32.mxu1 %v18_v17  ;;  %v22_v20 = vld [vmem:[%s1682_s0 + $0x28] sm:$0x3f]  ;;  %v75_v25 = vld [vmem:[%s1681_s1 + $0x190] sm:$0xff]  ;;  %v201_v26 = vld [vmem:[%s1681_s1 + $0x580] sm:$0xff]  ;;  %v763_v27 = vpack.c.bf16 %v204_v19, %v202_v18 }
  0x24   :  { %487 = vmatprep.mubr.f32.mxu0 %v22_v20  ;;  %v203_v28 = vld [vmem:[%s1681_s1 + $0x590] sm:$0xff]  ;;  %v78_v29 = vld [vmem:[%s1681_s1 + $0x1a8] sm:$0xff]  ;;  %v80_v30 = vld [vmem:[%s1681_s1 + $0x1b8] sm:$0xff]  ;;  %v637_v33 = vpack.c.bf16 %v75_v25, %v73_v24 }
  0x25   :  { %622 = vmatpush1.bf16.msra.mxu1 %v621_v47  ;;  %v206_v31 = vld [vmem:[%s1681_s1 + $0x5a8] sm:$0xff]  ;;  %v208_v32 = vld [vmem:[%s1681_s1 + $0x5b8] sm:$0xff]  ;;  %v765_v34 = vpack.c.bf16 %v203_v28, %v201_v26  ;;  %v639_v35 = vpack.c.bf16 %v80_v30, %v78_v29  ;;  %v77_v36 = vld [vmem:[%s1681_s1 + $0x1a0] sm:$0xff] }
  0x26   :  { %750 = vmatpush1.bf16.msra.mxu0 %v749_v48  ;;  %624 = vmatprep.subr.bf16.mxu1 %v623_v49  ;;  %v79_v37 = vld [vmem:[%s1681_s1 + $0x1b0] sm:$0xff]  ;;  %v205_v38 = vld [vmem:[%s1681_s1 + $0x5a0] sm:$0xff]  ;;  %v767_v39 = vpack.c.bf16 %v208_v32, %v206_v31  ;;  %v82_v41 = vld [vmem:[%s1681_s1 + $0x1c8] sm:$0xff] }
  0x27   :  { %752 = vmatprep.subr.bf16.mxu0 %v751_v53  ;;  %v207_v40 = vld [vmem:[%s1681_s1 + $0x5b0] sm:$0xff]  ;;  %v84_v42 = vld [vmem:[%s1681_s1 + $0x1d8] sm:$0xff]  ;;  %v210_v43 = vld [vmem:[%s1681_s1 + $0x5c8] sm:$0xff]  ;;  %v641_v45 = vpack.c.bf16 %v79_v37, %v77_v36 }
  0x28   :  { %v212_v44 = vld [vmem:[%s1681_s1 + $0x5d8] sm:$0xff]  ;;  %v769_v46 = vpack.c.bf16 %v207_v40, %v205_v38  ;;  %v643_v47 = vpack.c.bf16 %v84_v42, %v82_v41  ;;  %v81_v48 = vld [vmem:[%s1681_s1 + $0x1c0] sm:$0xff]  ;;  %v83_v49 = vld [vmem:[%s1681_s1 + $0x1d0] sm:$0xff] }
  0x29   :  { %626 = vmatpush1.bf16.msra.mxu1 %v625_v59  ;;  %v209_v50 = vld [vmem:[%s1681_s1 + $0x5c0] sm:$0xff]  ;;  %v771_v51 = vpack.c.bf16 %v212_v44, %v210_v43  ;;  %v211_v52 = vld [vmem:[%s1681_s1 + $0x5d0] sm:$0xff]  ;;  %v86_v53 = vld [vmem:[%s1681_s1 + $0x1e8] sm:$0xff]  ;;  %v645_v57 = vpack.c.bf16 %v83_v49, %v81_v48 }
  0x2a   :  { %754 = vmatpush1.bf16.msra.mxu0 %v753_v60  ;;  %628 = vmatprep.subr.bf16.mxu1 %v627_v61  ;;  %v88_v54 = vld [vmem:[%s1681_s1 + $0x1f8] sm:$0xff]  ;;  %v214_v55 = vld [vmem:[%s1681_s1 + $0x5e8] sm:$0xff]  ;;  %v773_v58 = vpack.c.bf16 %v211_v52, %v209_v50  ;;  %v85_v60 = vld [vmem:[%s1681_s1 + $0x1e0] sm:$0xff] }
  0x2b   :  { %756 = vmatprep.subr.bf16.mxu0 %v755_v1  ;;  %v216_v56 = vld [vmem:[%s1681_s1 + $0x5f8] sm:$0xff]  ;;  %v647_v59 = vpack.c.bf16 %v88_v54, %v86_v53  ;;  %v87_v61 = vld [vmem:[%s1681_s1 + $0x1f0] sm:$0xff]  ;;  %v213_v62 = vld [vmem:[%s1681_s1 + $0x5e0] sm:$0xff] }
  0x2c   :  { %v775_v63 = vpack.c.bf16 %v216_v56, %v214_v55  ;;  %v215_v0 = vld [vmem:[%s1681_s1 + $0x5f0] sm:$0xff]  ;;  %v90_v1 = vld [vmem:[%s1681_s1 + $0x208] sm:$0xff]  ;;  %v92_v2 = vld [vmem:[%s1681_s1 + $0x218] sm:$0xff]  ;;  %v649_v5 = vpack.c.bf16 %v87_v61, %v85_v60 }
  0x2d   :  { %630 = vmatpush1.bf16.msra.mxu1 %v629_v7  ;;  %v218_v3 = vld [vmem:[%s1681_s1 + $0x608] sm:$0xff]  ;;  %v220_v4 = vld [vmem:[%s1681_s1 + $0x618] sm:$0xff]  ;;  %v777_v6 = vpack.c.bf16 %v215_v0, %v213_v62  ;;  %v651_v7 = vpack.c.bf16 %v92_v2, %v90_v1  ;;  %v89_v8 = vld [vmem:[%s1681_s1 + $0x200] sm:$0xff] }
  0x2e   :  { %758 = vmatpush1.bf16.msra.mxu0 %v757_v9  ;;  %632 = vmatprep.subr.bf16.mxu1 %v631_v10  ;;  %v91_v9 = vld [vmem:[%s1681_s1 + $0x210] sm:$0xff]  ;;  %v217_v10 = vld [vmem:[%s1681_s1 + $0x600] sm:$0xff]  ;;  %v779_v11 = vpack.c.bf16 %v220_v4, %v218_v3  ;;  %v94_v13 = vld [vmem:[%s1681_s1 + $0x228] sm:$0xff] }
  0x2f   :  { %760 = vmatprep.subr.bf16.mxu0 %v759_v14  ;;  %v219_v12 = vld [vmem:[%s1681_s1 + $0x610] sm:$0xff]  ;;  %v96_v14 = vld [vmem:[%s1681_s1 + $0x238] sm:$0xff]  ;;  %v222_v15 = vld [vmem:[%s1681_s1 + $0x628] sm:$0xff]  ;;  %v653_v18 = vpack.c.bf16 %v91_v9, %v89_v8 }
  0x30   :  { %v224_v16 = vld [vmem:[%s1681_s1 + $0x638] sm:$0xff]  ;;  %v17_v17 = vld [vmem:[%s1682_s0] sm:$0x3f]  ;;  %v781_v20 = vpack.c.bf16 %v219_v12, %v217_v10  ;;  %v223_v26 = vld [vmem:[%s1681_s1 + $0x630] sm:$0xff] }
  0x31   :  { %634 = vmatpush1.bf16.msra.mxu1 %v633_v21  ;;  %v21_v19 = vld [vmem:[%s1682_s0 + $0x20] sm:$0x3f]  ;;  %v655_v21 = vpack.c.bf16 %v96_v14, %v94_v13  ;;  %v783_v25 = vpack.c.bf16 %v224_v16, %v222_v15  ;;  %v100_v28 = vld [vmem:[%s1681_s1 + $0x258] sm:$0xff]  ;;  %v226_v29 = vld [vmem:[%s1681_s1 + $0x648] sm:$0xff] }
  0x32   :  { %762 = vmatpush1.bf16.msra.mxu0 %v761_v22  ;;  %636 = vmatprep.subr.bf16.mxu1 %v635_v23  ;;  %v93_v22 = vld [vmem:[%s1681_s1 + $0x220] sm:$0xff]  ;;  %v95_v23 = vld [vmem:[%s1681_s1 + $0x230] sm:$0xff]  ;;  %v228_v30 = vld [vmem:[%s1681_s1 + $0x658] sm:$0xff] }
  0x33   :  { %764 = vmatprep.subr.bf16.mxu0 %v763_v27  ;;  %v221_v24 = vld [vmem:[%s1681_s1 + $0x620] sm:$0xff]  ;;  %v98_v27 = vld [vmem:[%s1681_s1 + $0x248] sm:$0xff]  ;;  %v657_v31 = vpack.c.bf16 %v95_v23, %v93_v22  ;;  %v787_v37 = vpack.c.bf16 %v228_v30, %v226_v29  ;;  %v227_v38 = vld [vmem:[%s1681_s1 + $0x650] sm:$0xff] }
  0x34   :  { %v785_v32 = vpack.c.bf16 %v223_v26, %v221_v24  ;;  %v225_v36 = vld [vmem:[%s1681_s1 + $0x640] sm:$0xff]  ;;  %v104_v40 = vld [vmem:[%s1681_s1 + $0x278] sm:$0xff]  ;;  %v230_v41 = vld [vmem:[%s1681_s1 + $0x668] sm:$0xff] }
  0x35   :  { %638 = vmatpush1.bf16.msra.mxu1 %v637_v33  ;;  %v659_v33 = vpack.c.bf16 %v100_v28, %v98_v27  ;;  %v232_v42 = vld [vmem:[%s1681_s1 + $0x678] sm:$0xff]  ;;  %v789_v44 = vpack.c.bf16 %v227_v38, %v225_v36  ;;  %v229_v48 = vld [vmem:[%s1681_s1 + $0x660] sm:$0xff]  ;;  %v231_v50 = vld [vmem:[%s1681_s1 + $0x670] sm:$0xff] }
  0x36   :  { %766 = vmatpush1.bf16.msra.mxu0 %v765_v34  ;;  %640 = vmatprep.subr.bf16.mxu1 %v639_v35  ;;  %v97_v34 = vld [vmem:[%s1681_s1 + $0x240] sm:$0xff]  ;;  %v99_v35 = vld [vmem:[%s1681_s1 + $0x250] sm:$0xff]  ;;  %v791_v49 = vpack.c.bf16 %v232_v42, %v230_v41  ;;  %v108_v52 = vld [vmem:[%s1681_s1 + $0x298] sm:$0xff]  ;;  %v793_v56 = vpack.c.bf16 %v231_v50, %v229_v48 }
  0x37   :  { %768 = vmatprep.subr.bf16.mxu0 %v767_v39  ;;  %v102_v39 = vld [vmem:[%s1681_s1 + $0x268] sm:$0xff]  ;;  %v661_v43 = vpack.c.bf16 %v99_v35, %v97_v34  ;;  %v236_v54 = vld [vmem:[%s1681_s1 + $0x698] sm:$0xff]  ;;  %v233_v60 = vld [vmem:[%s1681_s1 + $0x680] sm:$0xff] }
  0x38   :  { %v234_v53 = vld [vmem:[%s1681_s1 + $0x688] sm:$0xff]  ;;  %v235_v62 = vld [vmem:[%s1681_s1 + $0x690] sm:$0xff]  ;;  %v112_v0 = vld [vmem:[%s1681_s1 + $0x2b8] sm:$0xff] }
  0x39   :  { %642 = vmatpush1.bf16.msra.mxu1 %v641_v45  ;;  %v663_v45 = vpack.c.bf16 %v104_v40, %v102_v39  ;;  %v795_v61 = vpack.c.bf16 %v236_v54, %v234_v53  ;;  %v238_v1 = vld [vmem:[%s1681_s1 + $0x6a8] sm:$0xff]  ;;  %v240_v2 = vld [vmem:[%s1681_s1 + $0x6b8] sm:$0xff]  ;;  %v797_v4 = vpack.c.bf16 %v235_v62, %v233_v60  ;;  %v237_v8 = vld [vmem:[%s1681_s1 + $0x6a0] sm:$0xff] }
  0x3a   :  { %770 = vmatpush1.bf16.msra.mxu0 %v769_v46  ;;  %644 = vmatprep.subr.bf16.mxu1 %v643_v47  ;;  %v101_v46 = vld [vmem:[%s1681_s1 + $0x260] sm:$0xff]  ;;  %v103_v47 = vld [vmem:[%s1681_s1 + $0x270] sm:$0xff]  ;;  %v799_v9 = vpack.c.bf16 %v240_v2, %v238_v1  ;;  %v116_v12 = vld [vmem:[%s1681_s1 + $0x2d8] sm:$0xff] }
  0x3b   :  { %772 = vmatprep.subr.bf16.mxu0 %v771_v51  ;;  %v106_v51 = vld [vmem:[%s1681_s1 + $0x288] sm:$0xff]  ;;  %v665_v55 = vpack.c.bf16 %v103_v47, %v101_v46  ;;  %v239_v10 = vld [vmem:[%s1681_s1 + $0x6b0] sm:$0xff]  ;;  %v244_v14 = vld [vmem:[%s1681_s1 + $0x6d8] sm:$0xff] }
  0x3c   :  { %v242_v13 = vld [vmem:[%s1681_s1 + $0x6c8] sm:$0xff]  ;;  %v113_v16 = vld [vmem:[%s1681_s1 + $0x2c0] sm:$0xff]  ;;  %v120_v24 = vld [vmem:[%s1681_s1 + $0x2f8] sm:$0xff] }
  0x3d   :  { %646 = vmatpush1.bf16.msra.mxu1 %v645_v57  ;;  %v667_v57 = vpack.c.bf16 %v108_v52, %v106_v51  ;;  %v803_v22 = vpack.c.bf16 %v244_v14, %v242_v13  ;;  %v118_v23 = vld [vmem:[%s1681_s1 + $0x2e8] sm:$0xff]  ;;  %v248_v27 = vld [vmem:[%s1681_s1 + $0x6f8] sm:$0xff]  ;;  %v565_v30 = vld [vmem:[%s1683_s2] sm:$0x3f] }
  0x3e   :  { %774 = vmatpush1.bf16.msra.mxu0 %v773_v58  ;;  %648 = vmatprep.subr.bf16.mxu1 %v647_v59  ;;  %v105_v58 = vld [vmem:[%s1681_s1 + $0x280] sm:$0xff]  ;;  %v107_v59 = vld [vmem:[%s1681_s1 + $0x290] sm:$0xff]  ;;  %v246_v26 = vld [vmem:[%s1681_s1 + $0x6e8] sm:$0xff] }
  0x3f   :  { %776 = vmatprep.subr.bf16.mxu0 %v775_v63  ;;  %v110_v63 = vld [vmem:[%s1681_s1 + $0x2a8] sm:$0xff]  ;;  %v669_v3 = vpack.c.bf16 %v107_v59, %v105_v58  ;;  %v24_v28 = vld [vmem:[%s1682_s0 + $0x38] sm:$0x3f]  ;;  %v119_v34 = vld [vmem:[%s1681_s1 + $0x2f0] sm:$0xff]  ;;  %v807_v36 = vpack.c.bf16 %v248_v27, %v246_v26  ;;  %568 = vperm.xlu0 %850, %v565_v30  }
  0x40   :  { %v245_v35 = vld [vmem:[%s1681_s1 + $0x6e0] sm:$0xff]  ;;  %v122_v38 = vld [vmem:[%s1681_s1 + $0x308] sm:$0xff]  ;;  %v124_v39 = vld [vmem:[%s1681_s1 + $0x318] sm:$0xff] }
  0x41   :  { %650 = vmatpush1.bf16.msra.mxu1 %v649_v5  ;;  %v671_v5 = vpack.c.bf16 %v112_v0, %v110_v63  ;;  %v250_v40 = vld [vmem:[%s1681_s1 + $0x708] sm:$0xff]  ;;  %v252_v41 = vld [vmem:[%s1681_s1 + $0x718] sm:$0xff]  ;;  %v573_v42 = vld [vmem:[%s1684_s3] sm:$0x3f] }
  0x42   :  { %778 = vmatpush1.bf16.msra.mxu0 %v777_v6  ;;  %652 = vmatprep.subr.bf16.mxu1 %v651_v7  ;;  %v109_v6 = vld [vmem:[%s1681_s1 + $0x2a0] sm:$0xff]  ;;  %v111_v7 = vld [vmem:[%s1681_s1 + $0x2b0] sm:$0xff]  ;;  %v126_v51 = vld [vmem:[%s1681_s1 + $0x328] sm:$0xff] }
  0x43   :  { %780 = vmatprep.subr.bf16.mxu0 %v779_v11  ;;  %v114_v11 = vld [vmem:[%s1681_s1 + $0x2c8] sm:$0xff]  ;;  %v673_v15 = vpack.c.bf16 %v111_v7, %v109_v6  ;;  %v121_v46 = vld [vmem:[%s1681_s1 + $0x300] sm:$0xff]  ;;  %v123_v47 = vld [vmem:[%s1681_s1 + $0x310] sm:$0xff]  ;;  %576 = vperm.xlu0 %850, %v573_v42  }
  0x44   :  { %346 = vmatmul.mubr.f32.vlgmr.msra.gmra.mrb[0].mxu1 %v17_v17  ;;  %v801_v17 = vpack.c.bf16 %v239_v10, %v237_v8  ;;  %v249_v48 = vld [vmem:[%s1681_s1 + $0x700] sm:$0xff]  ;;  %v251_v50 = vld [vmem:[%s1681_s1 + $0x710] sm:$0xff]  ;;  %v128_v52 = vld [vmem:[%s1681_s1 + $0x338] sm:$0xff] }
  0x45   :  { %654 = vmatpush1.bf16.msra.mxu1 %v653_v18  ;;  %488 = vmatmul.mubr.f32.vlgmr.msra.gmra.mrb[0].mxu0 %v21_v19  ;;  %v675_v18 = vpack.c.bf16 %v116_v12, %v114_v11  ;;  %v115_v19 = vld [vmem:[%s1681_s1 + $0x2d0] sm:$0xff]  ;;  %v254_v53 = vld [vmem:[%s1681_s1 + $0x728] sm:$0xff]  ;;  %v256_v54 = vld [vmem:[%s1681_s1 + $0x738] sm:$0xff] }
  0x46   :  { %782 = vmatpush1.bf16.msra.mxu0 %v781_v20  ;;  %656 = vmatprep.subr.bf16.mxu1 %v655_v21  ;;  %v241_v20 = vld [vmem:[%s1681_s1 + $0x6c0] sm:$0xff]  ;;  %v243_v21 = vld [vmem:[%s1681_s1 + $0x6d0] sm:$0xff]  ;;  %v677_v29 = vpack.c.bf16 %v115_v19, %v113_v16  ;;  %v130_v63 = vld [vmem:[%s1681_s1 + $0x348] sm:$0xff] }
  0x47   :  { %784 = vmatprep.subr.bf16.mxu0 %v783_v25  ;;  %v20_v25 = vld [vmem:[%s1682_s0 + $0x18] sm:$0x3f]  ;;  %558 = vmatprep.mubr.f32.mxu0 %v24_v28  ;;  %v125_v58 = vld [vmem:[%s1681_s1 + $0x320] sm:$0xff]  ;;  %v127_v59 = vld [vmem:[%s1681_s1 + $0x330] sm:$0xff] }
  0x48   :  { %416 = vmatprep.mubr.f32.mxu1 %v20_v25  ;;  %v253_v60 = vld [vmem:[%s1681_s1 + $0x720] sm:$0xff]  ;;  %v255_v62 = vld [vmem:[%s1681_s1 + $0x730] sm:$0xff]  ;;  %v132_v0 = vld [vmem:[%s1681_s1 + $0x358] sm:$0xff] }
  0x49   :  { %658 = vmatpush1.bf16.msra.mxu1 %v657_v31  ;;  %v805_v31 = vpack.c.bf16 %v243_v21, %v241_v20  ;;  %v258_v1 = vld [vmem:[%s1681_s1 + $0x748] sm:$0xff]  ;;  %v260_v2 = vld [vmem:[%s1681_s1 + $0x758] sm:$0xff]  ;;  %v129_v6 = vld [vmem:[%s1681_s1 + $0x340] sm:$0xff] }
  0x4a   :  { %786 = vmatpush1.bf16.msra.mxu0 %v785_v32  ;;  %660 = vmatprep.subr.bf16.mxu1 %v659_v33  ;;  %v679_v32 = vpack.c.bf16 %v120_v24, %v118_v23  ;;  %v117_v33 = vld [vmem:[%s1681_s1 + $0x2e0] sm:$0xff]  ;;  %v131_v7 = vld [vmem:[%s1681_s1 + $0x350] sm:$0xff]  ;;  %v134_v11 = vld [vmem:[%s1681_s1 + $0x368] sm:$0xff] }
  0x4b   :  { %788 = vmatprep.subr.bf16.mxu0 %v787_v37  ;;  %v247_v37 = vld [vmem:[%s1681_s1 + $0x6f0] sm:$0xff]  ;;  %v257_v8 = vld [vmem:[%s1681_s1 + $0x740] sm:$0xff]  ;;  %v136_v12 = vld [vmem:[%s1681_s1 + $0x378] sm:$0xff] }
  0x4c   :  { %v259_v10 = vld [vmem:[%s1681_s1 + $0x750] sm:$0xff]  ;;  %v262_v13 = vld [vmem:[%s1681_s1 + $0x768] sm:$0xff]  ;;  %v264_v14 = vld [vmem:[%s1681_s1 + $0x778] sm:$0xff] }
  0x4d   :  { %662 = vmatpush1.bf16.msra.mxu1 %v661_v43  ;;  %v681_v43 = vpack.c.bf16 %v119_v34, %v117_v33  ;;  %v821_v16 = vpack.c.bf16 %v259_v10, %v257_v8  ;;  %v135_v19 = vld [vmem:[%s1681_s1 + $0x370] sm:$0xff]  ;;  %v261_v20 = vld [vmem:[%s1681_s1 + $0x760] sm:$0xff]  ;;  %v823_v21 = vpack.c.bf16 %v264_v14, %v262_v13  ;;  %v138_v23 = vld [vmem:[%s1681_s1 + $0x388] sm:$0xff] }
  0x4e   :  { %790 = vmatpush1.bf16.msra.mxu0 %v789_v44  ;;  %664 = vmatprep.subr.bf16.mxu1 %v663_v45  ;;  %v809_v44 = vpack.c.bf16 %v247_v37, %v245_v35  ;;  %v683_v45 = vpack.c.bf16 %v124_v39, %v122_v38  ;;  %v140_v24 = vld [vmem:[%s1681_s1 + $0x398] sm:$0xff]  ;;  %v266_v25 = vld [vmem:[%s1681_s1 + $0x788] sm:$0xff]  ;;  %v137_v30 = vld [vmem:[%s1681_s1 + $0x380] sm:$0xff] }
  0x4f   :  { %792 = vmatprep.subr.bf16.mxu0 %v791_v49  ;;  %v811_v49 = vpack.c.bf16 %v252_v41, %v250_v40  ;;  %v268_v26 = vld [vmem:[%s1681_s1 + $0x798] sm:$0xff]  ;;  %v267_v34 = vld [vmem:[%s1681_s1 + $0x790] sm:$0xff]  ;;  %v142_v35 = vld [vmem:[%s1681_s1 + $0x3a8] sm:$0xff] }
  0x50   :  { %v827_v33 = vpack.c.bf16 %v268_v26, %v266_v25  ;;  %v270_v37 = vld [vmem:[%s1681_s1 + $0x7a8] sm:$0xff]  ;;  %v272_v38 = vld [vmem:[%s1681_s1 + $0x7b8] sm:$0xff]  ;;  %v141_v42 = vld [vmem:[%s1681_s1 + $0x3a0] sm:$0xff] }
  0x51   :  { %666 = vmatpush1.bf16.msra.mxu1 %v665_v55  ;;  %v685_v55 = vpack.c.bf16 %v123_v47, %v121_v46  ;;  %v271_v46 = vld [vmem:[%s1681_s1 + $0x7b0] sm:$0xff]  ;;  %v146_v47 = vld [vmem:[%s1681_s1 + $0x3c8] sm:$0xff] }
  0x52   :  { %794 = vmatpush1.bf16.msra.mxu0 %v793_v56  ;;  %668 = vmatprep.subr.bf16.mxu1 %v667_v57  ;;  %v813_v56 = vpack.c.bf16 %v251_v50, %v249_v48  ;;  %v687_v57 = vpack.c.bf16 %v128_v52, %v126_v51  ;;  %v148_v48 = vld [vmem:[%s1681_s1 + $0x3d8] sm:$0xff]  ;;  %v23_v10 = vld [vmem:[%s1682_s0 + $0x30] sm:$0x3f] }
  0x53   :  { %796 = vmatprep.subr.bf16.mxu0 %v795_v61  ;;  %v815_v61 = vpack.c.bf16 %v256_v54, %v254_v53  ;;  %v276_v50 = vld [vmem:[%s1681_s1 + $0x7d8] sm:$0xff]  ;;  %v707_v53 = vpack.c.bf16 %v148_v48, %v146_v47  ;;  %v145_v54 = vld [vmem:[%s1681_s1 + $0x3c0] sm:$0xff] }
  0x55   :  { %670 = vmatpush1.bf16.msra.mxu1 %v669_v3  ;;  %v689_v3 = vpack.c.bf16 %v127_v59, %v125_v58  ;;  %v275_v58 = vld [vmem:[%s1681_s1 + $0x7d0] sm:$0xff]  ;;  %v150_v59 = vld [vmem:[%s1681_s1 + $0x3e8] sm:$0xff] }
  0x56   :  { %798 = vmatpush1.bf16.msra.mxu0 %v797_v4  ;;  %672 = vmatprep.subr.bf16.mxu1 %v671_v5  ;;  %v817_v4 = vpack.c.bf16 %v255_v62, %v253_v60  ;;  %v691_v5 = vpack.c.bf16 %v132_v0, %v130_v63  ;;  %v152_v60 = vld [vmem:[%s1681_s1 + $0x3f8] sm:$0xff] }
  0x57   :  { %800 = vmatprep.subr.bf16.mxu0 %v799_v9  ;;  %v819_v9 = vpack.c.bf16 %v260_v2, %v258_v1  ;;  %v280_v62 = vld [vmem:[%s1681_s1 + $0x7f8] sm:$0xff]  ;;  %v711_v1 = vpack.c.bf16 %v152_v60, %v150_v59  ;;  %v149_v2 = vld [vmem:[%s1681_s1 + $0x3e0] sm:$0xff] }
  0x59   :  { %674 = vmatpush1.bf16.msra.mxu1 %v673_v15  ;;  %v693_v15 = vpack.c.bf16 %v131_v7, %v129_v6  ;;  %v279_v6 = vld [vmem:[%s1681_s1 + $0x7f0] sm:$0xff] }
  0x5a   :  { %802 = vmatpush1.bf16.msra.mxu0 %v801_v17  ;;  %676 = vmatprep.subr.bf16.mxu1 %v675_v18  ;;  %v695_v17 = vpack.c.bf16 %v136_v12, %v134_v11  ;;  %v133_v18 = vld [vmem:[%s1681_s1 + $0x360] sm:$0xff] }
  0x5b   :  { %804 = vmatprep.subr.bf16.mxu0 %v803_v22  ;;  %v263_v22 = vld [vmem:[%s1681_s1 + $0x770] sm:$0xff]  ;;  %v697_v27 = vpack.c.bf16 %v135_v19, %v133_v18 }
  0x5c   :  { %v825_v28 = vpack.c.bf16 %v263_v22, %v261_v20 }
  0x5d   :  { %678 = vmatpush1.bf16.msra.mxu1 %v677_v29  ;;  %v699_v29 = vpack.c.bf16 %v140_v24, %v138_v23 }
  0x5e   :  { %806 = vmatpush1.bf16.msra.mxu0 %v805_v31  ;;  %680 = vmatprep.subr.bf16.mxu1 %v679_v32  ;;  %v139_v31 = vld [vmem:[%s1681_s1 + $0x390] sm:$0xff]  ;;  %v265_v32 = vld [vmem:[%s1681_s1 + $0x780] sm:$0xff] }
  0x5f   :  { %808 = vmatprep.subr.bf16.mxu0 %v807_v36  ;;  %v144_v36 = vld [vmem:[%s1681_s1 + $0x3b8] sm:$0xff]  ;;  %v701_v39 = vpack.c.bf16 %v139_v31, %v137_v30  ;;  %v829_v40 = vpack.c.bf16 %v267_v34, %v265_v32 }
  0x60   :  { %v703_v41 = vpack.c.bf16 %v144_v36, %v142_v35 }
  0x61   :  { %682 = vmatpush1.bf16.msra.mxu1 %v681_v43  ;;  %v143_v43 = vld [vmem:[%s1681_s1 + $0x3b0] sm:$0xff] }
  0x62   :  { %810 = vmatpush1.bf16.msra.mxu0 %v809_v44  ;;  %684 = vmatprep.subr.bf16.mxu1 %v683_v45  ;;  %v269_v44 = vld [vmem:[%s1681_s1 + $0x7a0] sm:$0xff]  ;;  %v831_v45 = vpack.c.bf16 %v272_v38, %v270_v37  ;;  %v705_v51 = vpack.c.bf16 %v143_v43, %v141_v42 }
  0x63   :  { %812 = vmatprep.subr.bf16.mxu0 %v811_v49  ;;  %v274_v49 = vld [vmem:[%s1681_s1 + $0x7c8] sm:$0xff]  ;;  %v833_v52 = vpack.c.bf16 %v271_v46, %v269_v44 }
  0x65   :  { %686 = vmatpush1.bf16.msra.mxu1 %v685_v55  ;;  %v147_v55 = vld [vmem:[%s1681_s1 + $0x3d0] sm:$0xff] }
  0x66   :  { %814 = vmatpush1.bf16.msra.mxu0 %v813_v56  ;;  %688 = vmatprep.subr.bf16.mxu1 %v687_v57  ;;  %v273_v56 = vld [vmem:[%s1681_s1 + $0x7c0] sm:$0xff]  ;;  %v835_v57 = vpack.c.bf16 %v276_v50, %v274_v49  ;;  %v709_v63 = vpack.c.bf16 %v147_v55, %v145_v54 }
  0x67   :  { %816 = vmatprep.subr.bf16.mxu0 %v815_v61  ;;  %v278_v61 = vld [vmem:[%s1681_s1 + $0x7e8] sm:$0xff]  ;;  %v837_v0 = vpack.c.bf16 %v275_v58, %v273_v56 }
  0x69   :  { %690 = vmatpush1.bf16.msra.mxu1 %v689_v3  ;;  %v151_v3 = vld [vmem:[%s1681_s1 + $0x3f0] sm:$0xff] }
  0x6a   :  { %818 = vmatpush1.bf16.msra.mxu0 %v817_v4  ;;  %692 = vmatprep.subr.bf16.mxu1 %v691_v5  ;;  %v839_v4 = vpack.c.bf16 %v280_v62, %v278_v61  ;;  %v277_v5 = vld [vmem:[%s1681_s1 + $0x7e0] sm:$0xff]  ;;  %v713_v7 = vpack.c.bf16 %v151_v3, %v149_v2 }
  0x6b   :  { %820 = vmatprep.subr.bf16.mxu0 %v819_v9  ;;  %v841_v8 = vpack.c.bf16 %v279_v6, %v277_v5  ;;  %v19_v9 = vld [vmem:[%s1682_s0 + $0x10] sm:$0x3f] }
  0x6d   :  { %694 = vmatpush1.bf16.msra.mxu1 %v693_v15 }
  0x6e   :  { %822 = vmatpush1.bf16.msra.mxu0 %v821_v16  ;;  %696 = vmatprep.subr.bf16.mxu1 %v695_v17 }
  0x6f   :  { %824 = vmatprep.subr.bf16.mxu0 %v823_v21 }
  0x71   :  { %698 = vmatpush1.bf16.msra.mxu1 %v697_v27 }
  0x72   :  { %826 = vmatpush1.bf16.msra.mxu0 %v825_v28  ;;  %700 = vmatprep.subr.bf16.mxu1 %v699_v29 }
  0x73   :  { %828 = vmatprep.subr.bf16.mxu0 %v827_v33 }
  0x75   :  { %702 = vmatpush1.bf16.msra.mxu1 %v701_v39 }
  0x76   :  { %830 = vmatpush1.bf16.msra.mxu0 %v829_v40  ;;  %704 = vmatprep.subr.bf16.mxu1 %v703_v41 }
  0x77   :  { %832 = vmatprep.subr.bf16.mxu0 %v831_v45 }
  0x79   :  { %706 = vmatpush1.bf16.msra.mxu1 %v705_v51 }
  0x7a   :  { %834 = vmatpush1.bf16.msra.mxu0 %v833_v52  ;;  %708 = vmatprep.subr.bf16.mxu1 %v707_v53 }
  0x7b   :  { %836 = vmatprep.subr.bf16.mxu0 %v835_v57 }
  0x7d   :  { %710 = vmatpush1.bf16.msra.mxu1 %v709_v63 }
  0x7e   :  { %838 = vmatpush1.bf16.msra.mxu0 %v837_v0  ;;  %712 = vmatprep.subr.bf16.mxu1 %v711_v1 }
  0x7f   :  { %840 = vmatprep.subr.bf16.mxu0 %v839_v4 }
  0x81   :  { %714 = vmatpush1.bf16.msra.mxu1 %v713_v7 }
  0x82   :  { %842 = vmatpush1.bf16.msra.mxu0 %v841_v8 }
  0x84   :  { %417 = vmatmul.mubr.f32.vlgmr.msra.gmra.mrb[0].mxu1 %v19_v9 }
  0x85   :  { %559 = vmatmul.mubr.f32.vlgmr.msra.gmra.mrb[0].mxu0 %v23_v10 }
  0xbe   :  { %v569_v11 = vpop.permute.xlu0 %568 }
  0xc2   :  { %v577_v19 = vpop.permute.xlu0 %576 }
 0x157   :  { %v418_v12 = vpop.f32.mrb[0].mxu1 }
 0x158   :  { %v560_v13 = vpop.f32.mrb[0].mxu0  ;;  %v420_v14 = vpop.f32.mrb[1].mxu1 }
 0x159   :  { %v843_v15 = vadd.f32 %v560_v13, %v418_v12  ;;  %v562_v16 = vpop.f32.mrb[1].mxu0 }
 0x15a   :  { %v844_v17 = vadd.f32 %v562_v16, %v420_v14 }
 0x15b   :  { %v571_v18 = vmul.f32 %v843_v15, %v569_v11 }
 0x15c   :  { %v572_v20 = vmul.f32 %v844_v17, %v569_v11 }
 0x15d   :  { %v579_v21 = vadd.f32 %v577_v19, %v571_v18 }
 0x15e   :  { %v580_v22 = vadd.f32 %v577_v19, %v572_v20 }
 0x15f   :  { %581 = vst [vmem:[%s1685_s4] sm:$0x3f] %v579_v21 }
 0x160   :  { %582 = vst [vmem:[%s1685_s4 + $0x8] sm:$0x3f] %v580_v22 }

</bundles_post_ra>
